<compile_context>
chip_gen: v6e
topology: v6e:2x2x1
jax: 0.10.0
libtpu: 0.0.40
codegen_flags: <defaults>
</compile_context>

<pallas_src>
import functools

import jax
import jax.numpy as jnp
from jax.experimental import pallas as pl
from jax.experimental.pallas import tpu as pltpu

_NEG = -1e30  # "minus infinity" that never produces NaNs in exp()


def _logits_and_stats_kernel(valid_b, tb,
                             x_ref, w1_ref, b1_ref, w2_ref, b2_ref,
                             w3_ref, b3_ref,
                             logits_ref, m_ref, l_ref):
    """Pass 1 (grid over B tiles, 'arbitrary' axis).

    Writes the (A, TB) logits tile and maintains the online row-max `m` and
    row-sum-exp `l` over the batch/lane axis (this is the Softmax(dim=0)
    reduction of the PyTorch module).  `m` and `l` are resident (A, 1)
    output blocks (constant block index across the grid)."""
    t = pl.program_id(0)

    @pl.when(t == 0)
    def _():
        m_ref[...] = jnp.full_like(m_ref, _NEG)
        l_ref[...] = jnp.zeros_like(l_ref)

    x = x_ref[...]                                            # (D, TB)

    # Layer 1: Linear(D -> 16) + ReLU
    h1 = jnp.dot(w1_ref[...], x, preferred_element_type=jnp.float32)
    h1 = jnp.maximum(h1 + b1_ref[...], 0.0)                   # (16, TB)

    # Layer 2: Linear(16 -> 8) + ReLU
    h2 = jnp.dot(w2_ref[...], h1, preferred_element_type=jnp.float32)
    h2 = jnp.maximum(h2 + b2_ref[...], 0.0)                   # (8, TB)

    # Layer 3: Linear(8 -> A)
    logits = jnp.dot(w3_ref[...], h2, preferred_element_type=jnp.float32)
    logits = logits + b3_ref[...]                             # (A, TB)
    logits_ref[...] = logits

    # Mask padded lanes (global batch index >= valid_b) out of the reduction.
    col = jax.lax.broadcasted_iota(jnp.int32, logits.shape, 1) + t * tb
    s = jnp.where(col < valid_b, logits, _NEG)

    m_old = m_ref[...]                                        # (A, 1)
    m_new = jnp.maximum(m_old, jnp.max(s, axis=-1, keepdims=True))
    alpha = jnp.exp(m_old - m_new)                            # 0 on first tile
    p = jnp.exp(s - m_new)                                    # 0 on masked lanes
    l_ref[...] = alpha * l_ref[...] + jnp.sum(p, axis=-1, keepdims=True)
    m_ref[...] = m_new


def _normalize_kernel(logits_ref, m_ref, l_ref, out_ref):
    """Pass 2 (grid over B tiles, 'parallel'): probs = exp(logits - m) / l."""
    inv_l = pl.reciprocal(l_ref[...], approx=True)            # EUP slot, ~free
    out_ref[...] = jnp.exp(logits_ref[...] - m_ref[...]) * inv_l


def prepare_params(params):
    """One-time layout prep (hoisted out of the per-step call path).

    Weights stay in torch (out, in) layout; biases become (out, 1) columns
    so they lane-broadcast inside the kernel."""
    return dict(
        W1=params["W1"], b1=params["b1"].reshape(-1, 1),
        W2=params["W2"], b2=params["b2"].reshape(-1, 1),
        W3=params["W3"], b3=params["b3"].reshape(-1, 1),
    )


def reinforce_forward(x, prepared, *, tb=128):
    """x: (B, dim_observation) f32.  Returns (B, n_actions) probabilities with
    softmax taken over dim 0 (the batch axis), exactly like the module.
    For large B, raise tb (512-2048) for better DMA/compute overlap."""
    B, D = x.shape
    W1, b1 = prepared["W1"], prepared["b1"]
    W2, b2 = prepared["W2"], prepared["b2"]
    W3, b3 = prepared["W3"], prepared["b3"]
    A = W3.shape[0]

    num_tiles = pl.cdiv(B, tb)
    Bp = num_tiles * tb

    xt = x.T                                                  # (D, B): B on lanes
    if Bp != B:
        xt = jnp.pad(xt, ((0, 0), (0, Bp - B)))

    def const(shape):
        return pl.BlockSpec(shape, lambda t: (0, 0))

    # ---- Pass 1: logits tiles + online (max, sum-exp) over the batch axis.
    logits, m, l = pl.pallas_call(
        functools.partial(_logits_and_stats_kernel, B, tb),
        grid=(num_tiles,),
        in_specs=[
            pl.BlockSpec((D, tb), lambda t: (0, t)),          # x tile
            const(W1.shape), const(b1.shape),
            const(W2.shape), const(b2.shape),
            const(W3.shape), const(b3.shape),
        ],
        out_specs=(
            pl.BlockSpec((A, tb), lambda t: (0, t)),          # logits tile
            const((A, 1)),                                    # running max
            const((A, 1)),                                    # running sum-exp
        ),
        out_shape=(
            jax.ShapeDtypeStruct((A, Bp), jnp.float32),
            jax.ShapeDtypeStruct((A, 1), jnp.float32),
            jax.ShapeDtypeStruct((A, 1), jnp.float32),
        ),
        compiler_params=pltpu.CompilerParams(
            dimension_semantics=("arbitrary",)),
    )(xt, W1, b1, W2, b2, W3, b3)

    # ---- Pass 2: lane-dense normalize, parallel over tiles (2 TCs on v7x).
    probs_t = pl.pallas_call(
        _normalize_kernel,
        grid=(num_tiles,),
        in_specs=[
            pl.BlockSpec((A, tb), lambda t: (0, t)),
            const((A, 1)),
            const((A, 1)),
        ],
        out_specs=pl.BlockSpec((A, tb), lambda t: (0, t)),
        out_shape=jax.ShapeDtypeStruct((A, Bp), jnp.float32),
        compiler_params=pltpu.CompilerParams(
            dimension_semantics=("parallel",)),
    )(logits, m, l)

    return probs_t[:, :B].T                                   # back to (B, A)


def init_params(key, dim_observation, n_actions):
    """Deterministic synthetic parameters with torch nn.Linear shapes."""
    keys = jax.random.split(key, 6)

    def lin(kw, kb, fan_in, fan_out):
        bound = 1.0 / jnp.sqrt(fan_in)
        W = jax.random.uniform(kw, (fan_out, fan_in), jnp.float32, -bound, bound)
        b = jax.random.uniform(kb, (fan_out,), jnp.float32, -bound, bound)
        return W, b

    W1, b1 = lin(keys[0], keys[1], dim_observation, 16)
    W2, b2 = lin(keys[2], keys[3], 16, 8)
    W3, b3 = lin(keys[4], keys[5], 8, n_actions)
    return {"W1": W1, "b1": b1, "W2": W2, "b2": b2, "W3": W3, "b3": b3}


def reference_forward(x, params):
    """Pure-JAX reference of the PyTorch forward (for correctness check)."""
    h1 = jnp.maximum(x @ params["W1"].T + params["b1"], 0.0)
    h2 = jnp.maximum(h1 @ params["W2"].T + params["b2"], 0.0)
    logits = h2 @ params["W3"].T + params["b3"]
    return jax.nn.softmax(logits, axis=0)                     # dim=0, as in module


if __name__ == "__main__":
    key = jax.random.PRNGKey(0)
    k_param, k_x1, k_x2 = jax.random.split(key, 3)

    dim_observation = 4
    n_actions = 2

    params = init_params(k_param, dim_observation, n_actions)
    prepared = prepare_params(params)

    # Small, module-scale case (single B tile, masked padding lanes).
    x_small = jax.random.normal(k_x1, (8, dim_observation), dtype=jnp.float32)
    out_small = jax.block_until_ready(reinforce_forward(x_small, prepared, tb=128))
    ref_small = reference_forward(x_small, params)
    assert out_small.shape == (8, n_actions)
    assert jnp.allclose(out_small, ref_small, rtol=2e-3, atol=1e-5), (
        out_small, ref_small)

    # Multi-tile case exercising the cross-tile online softmax + lane masking.
    x_big = jax.random.normal(k_x2, (300, dim_observation), dtype=jnp.float32)
    out_big = jax.block_until_ready(reinforce_forward(x_big, prepared, tb=128))
    ref_big = reference_forward(x_big, params)
    assert out_big.shape == (300, n_actions)
    assert jnp.allclose(out_big, ref_big, rtol=2e-3, atol=1e-5), (
        out_big, ref_big)

    print("KERNEL_OK")
</pallas_src>

<mosaic_0001>
module attributes {stable_mosaic.version = 11 : i64} {
  func.func @_logits_and_stats_kernel(%arg0: i32, %arg1: memref<4x128xf32, #tpu.memory_space<vmem>>, %arg2: memref<16x4xf32, #tpu.memory_space<vmem>>, %arg3: memref<16x1xf32, #tpu.memory_space<vmem>>, %arg4: memref<8x16xf32, #tpu.memory_space<vmem>>, %arg5: memref<8x1xf32, #tpu.memory_space<vmem>>, %arg6: memref<2x8xf32, #tpu.memory_space<vmem>>, %arg7: memref<2x1xf32, #tpu.memory_space<vmem>>, %arg8: memref<2x128xf32, #tpu.memory_space<vmem>>, %arg9: memref<2x1xf32, #tpu.memory_space<vmem>>, %arg10: memref<2x1xf32, #tpu.memory_space<vmem>>) attributes {dimension_semantics = [#tpu.dimension_semantics<arbitrary>], iteration_bounds = array<i64: 1>, scalar_prefetch = 0 : i64, scratch_operands = 0 : i64, tpu.core_type = #tpu.core_type<tc>, window_params = [{transform_indices = @transform_0, window_bounds = array<i64: 4, 128>}, {pipeline_mode = #tpu.pipeline_mode<synchronous>, transform_indices = @transform_1, window_bounds = array<i64: 16, 4>}, {pipeline_mode = #tpu.pipeline_mode<synchronous>, transform_indices = @transform_2, window_bounds = array<i64: 16, 1>}, {pipeline_mode = #tpu.pipeline_mode<synchronous>, transform_indices = @transform_3, window_bounds = array<i64: 8, 16>}, {pipeline_mode = #tpu.pipeline_mode<synchronous>, transform_indices = @transform_4, window_bounds = array<i64: 8, 1>}, {pipeline_mode = #tpu.pipeline_mode<synchronous>, transform_indices = @transform_5, window_bounds = array<i64: 2, 8>}, {pipeline_mode = #tpu.pipeline_mode<synchronous>, transform_indices = @transform_6, window_bounds = array<i64: 2, 1>}, {transform_indices = @transform_7, window_bounds = array<i64: 2, 128>}, {pipeline_mode = #tpu.pipeline_mode<synchronous>, transform_indices = @transform_8, window_bounds = array<i64: 2, 1>}, {pipeline_mode = #tpu.pipeline_mode<synchronous>, transform_indices = @transform_9, window_bounds = array<i64: 2, 1>}]} {
    %c0_i32 = arith.constant 0 : i32
    %0 = arith.cmpi eq, %arg0, %c0_i32 : i32
    %1 = arith.extui %0 : i1 to i32
    %c0_i32_0 = arith.constant 0 : i32
    %2 = arith.cmpi ne, %1, %c0_i32_0 : i32
    scf.if %2 {
      %cst_31 = arith.constant -1.000000e+30 : f32
      %48 = vector.broadcast %cst_31 : f32 to vector<2x1xf32>
      %c0_32 = arith.constant 0 : index
      %c0_33 = arith.constant 0 : index
      %49 = vector.load %arg9[%c0_32, %c0_33] : memref<2x1xf32, #tpu.memory_space<vmem>>, vector<2x1xf32>
      tpu.vector_store %arg9[%c0_32, %c0_33], %48 {strides = array<i32>} : memref<2x1xf32, #tpu.memory_space<vmem>>, vector<2x1xf32>,
      %cst_34 = arith.constant 0.000000e+00 : f32
      %50 = vector.broadcast %cst_34 : f32 to vector<2x1xf32>
      %c0_35 = arith.constant 0 : index
      %c0_36 = arith.constant 0 : index
      %51 = vector.load %arg10[%c0_35, %c0_36] : memref<2x1xf32, #tpu.memory_space<vmem>>, vector<2x1xf32>
      tpu.vector_store %arg10[%c0_35, %c0_36], %50 {strides = array<i32>} : memref<2x1xf32, #tpu.memory_space<vmem>>, vector<2x1xf32>,
    } else {
    }
    %c0 = arith.constant 0 : index
    %c0_1 = arith.constant 0 : index
    %3 = vector.load %arg1[%c0, %c0_1] : memref<4x128xf32, #tpu.memory_space<vmem>>, vector<4x128xf32>
    %c0_2 = arith.constant 0 : index
    %c0_3 = arith.constant 0 : index
    %4 = vector.load %arg2[%c0_2, %c0_3] : memref<16x4xf32, #tpu.memory_space<vmem>>, vector<16x4xf32>
    %cst = arith.constant dense<0.000000e+00> : vector<16x128xf32>
    %5 = tpu.matmul %4, %3, %cst {dimension_numbers = #tpu.dot_dimension_numbers<[1], [0], [0], [1], [0, 0, 1, 1], [], []>} : vector<16x4xf32>, vector<4x128xf32>, vector<16x128xf32> -> vector<16x128xf32>
    %c0_4 = arith.constant 0 : index
    %c0_5 = arith.constant 0 : index
    %6 = vector.load %arg3[%c0_4, %c0_5] : memref<16x1xf32, #tpu.memory_space<vmem>>, vector<16x1xf32>
    %7 = vector.broadcast %6 : vector<16x1xf32> to vector<16x128xf32>
    %8 = arith.addf %5, %7 : vector<16x128xf32>
    %cst_6 = arith.constant 0.000000e+00 : f32
    %9 = vector.broadcast %cst_6 : f32 to vector<16x128xf32>
    %10 = arith.maximumf %8, %9 : vector<16x128xf32>
    %c0_7 = arith.constant 0 : index
    %c0_8 = arith.constant 0 : index
    %11 = vector.load %arg4[%c0_7, %c0_8] : memref<8x16xf32, #tpu.memory_space<vmem>>, vector<8x16xf32>
    %cst_9 = arith.constant dense<0.000000e+00> : vector<8x128xf32>
    %12 = tpu.matmul %11, %10, %cst_9 {dimension_numbers = #tpu.dot_dimension_numbers<[1], [0], [0], [1], [0, 0, 1, 1], [], []>} : vector<8x16xf32>, vector<16x128xf32>, vector<8x128xf32> -> vector<8x128xf32>
    %c0_10 = arith.constant 0 : index
    %c0_11 = arith.constant 0 : index
    %13 = vector.load %arg5[%c0_10, %c0_11] : memref<8x1xf32, #tpu.memory_space<vmem>>, vector<8x1xf32>
    %14 = vector.broadcast %13 : vector<8x1xf32> to vector<8x128xf32>
    %15 = arith.addf %12, %14 : vector<8x128xf32>
    %cst_12 = arith.constant 0.000000e+00 : f32
    %16 = vector.broadcast %cst_12 : f32 to vector<8x128xf32>
    %17 = arith.maximumf %15, %16 : vector<8x128xf32>
    %c0_13 = arith.constant 0 : index
    %c0_14 = arith.constant 0 : index
    %18 = vector.load %arg6[%c0_13, %c0_14] : memref<2x8xf32, #tpu.memory_space<vmem>>, vector<2x8xf32>
    %cst_15 = arith.constant dense<0.000000e+00> : vector<2x128xf32>
    %19 = tpu.matmul %18, %17, %cst_15 {dimension_numbers = #tpu.dot_dimension_numbers<[1], [0], [0], [1], [0, 0, 1, 1], [], []>} : vector<2x8xf32>, vector<8x128xf32>, vector<2x128xf32> -> vector<2x128xf32>
    %c0_16 = arith.constant 0 : index
    %c0_17 = arith.constant 0 : index
    %20 = vector.load %arg7[%c0_16, %c0_17] : memref<2x1xf32, #tpu.memory_space<vmem>>, vector<2x1xf32>
    %21 = vector.broadcast %20 : vector<2x1xf32> to vector<2x128xf32>
    %22 = arith.addf %19, %21 : vector<2x128xf32>
    %c0_18 = arith.constant 0 : index
    %c0_19 = arith.constant 0 : index
    %23 = vector.load %arg8[%c0_18, %c0_19] : memref<2x128xf32, #tpu.memory_space<vmem>>, vector<2x128xf32>
    tpu.vector_store %arg8[%c0_18, %c0_19], %22 {strides = array<i32>} : memref<2x128xf32, #tpu.memory_space<vmem>>, vector<2x128xf32>,
    %24 = tpu.iota {dimensions = array<i32: 1>} : vector<2x128xi32>
    %c128_i32 = arith.constant 128 : i32
    %25 = arith.muli %arg0, %c128_i32 : i32
    %26 = vector.broadcast %25 : i32 to vector<2x128xi32>
    %27 = arith.addi %24, %26 : vector<2x128xi32>
    %c8_i32 = arith.constant 8 : i32
    %28 = vector.broadcast %c8_i32 : i32 to vector<2x128xi32>
    %29 = arith.cmpi slt, %27, %28 : vector<2x128xi32>
    %cst_20 = arith.constant -1.000000e+30 : f32
    %30 = vector.broadcast %cst_20 : f32 to vector<2x128xf32>
    %31 = arith.select %29, %22, %30 : vector<2x128xi1>, vector<2x128xf32>
    %c0_21 = arith.constant 0 : index
    %c0_22 = arith.constant 0 : index
    %32 = vector.load %arg9[%c0_21, %c0_22] : memref<2x1xf32, #tpu.memory_space<vmem>>, vector<2x1xf32>
    %cst_23 = arith.constant dense<0xFF800000> : vector<2xf32>
    %33 = vector.multi_reduction <maximumf>, %31, %cst_23 [1] : vector<2x128xf32> to vector<2xf32>
    %34 = vector.shape_cast %33 : vector<2xf32> to vector<2x1xf32>
    %35 = arith.maximumf %32, %34 : vector<2x1xf32>
    %36 = arith.subf %32, %35 : vector<2x1xf32>
    %37 = math.exp %36 : vector<2x1xf32>
    %38 = vector.broadcast %35 : vector<2x1xf32> to vector<2x128xf32>
    %39 = arith.subf %31, %38 : vector<2x128xf32>
    %40 = math.exp %39 : vector<2x128xf32>
    %c0_24 = arith.constant 0 : index
    %c0_25 = arith.constant 0 : index
    %41 = vector.load %arg10[%c0_24, %c0_25] : memref<2x1xf32, #tpu.memory_space<vmem>>, vector<2x1xf32>
    %42 = arith.mulf %37, %41 : vector<2x1xf32>
    %cst_26 = arith.constant dense<0.000000e+00> : vector<2xf32>
    %43 = vector.multi_reduction <add>, %40, %cst_26 [1] : vector<2x128xf32> to vector<2xf32>
    %44 = vector.shape_cast %43 : vector<2xf32> to vector<2x1xf32>
    %45 = arith.addf %42, %44 : vector<2x1xf32>
    %c0_27 = arith.constant 0 : index
    %c0_28 = arith.constant 0 : index
    %46 = vector.load %arg10[%c0_27, %c0_28] : memref<2x1xf32, #tpu.memory_space<vmem>>, vector<2x1xf32>
    tpu.vector_store %arg10[%c0_27, %c0_28], %45 {strides = array<i32>} : memref<2x1xf32, #tpu.memory_space<vmem>>, vector<2x1xf32>,
    %c0_29 = arith.constant 0 : index
    %c0_30 = arith.constant 0 : index
    %47 = vector.load %arg9[%c0_29, %c0_30] : memref<2x1xf32, #tpu.memory_space<vmem>>, vector<2x1xf32>
    tpu.vector_store %arg9[%c0_29, %c0_30], %35 {strides = array<i32>} : memref<2x1xf32, #tpu.memory_space<vmem>>, vector<2x1xf32>,
    return
  }
  func.func @transform_0(%arg0: i32) -> (i32, i32) {
    %c0_i32 = arith.constant 0 : i32
    %c0_i32_0 = arith.constant 0 : i32
    return %c0_i32, %arg0 : i32, i32
  }
  func.func @transform_1(%arg0: i32) -> (i32, i32) {
    %c0_i32 = arith.constant 0 : i32
    %c0_i32_0 = arith.constant 0 : i32
    %c0_i32_1 = arith.constant 0 : i32
    return %c0_i32, %c0_i32_0 : i32, i32
  }
  func.func @transform_2(%arg0: i32) -> (i32, i32) {
    %c0_i32 = arith.constant 0 : i32
    %c0_i32_0 = arith.constant 0 : i32
    %c0_i32_1 = arith.constant 0 : i32
    return %c0_i32, %c0_i32_0 : i32, i32
  }
  func.func @transform_3(%arg0: i32) -> (i32, i32) {
    %c0_i32 = arith.constant 0 : i32
    %c0_i32_0 = arith.constant 0 : i32
    %c0_i32_1 = arith.constant 0 : i32
    return %c0_i32, %c0_i32_0 : i32, i32
  }
  func.func @transform_4(%arg0: i32) -> (i32, i32) {
    %c0_i32 = arith.constant 0 : i32
    %c0_i32_0 = arith.constant 0 : i32
    %c0_i32_1 = arith.constant 0 : i32
    return %c0_i32, %c0_i32_0 : i32, i32
  }
  func.func @transform_5(%arg0: i32) -> (i32, i32) {
    %c0_i32 = arith.constant 0 : i32
    %c0_i32_0 = arith.constant 0 : i32
    %c0_i32_1 = arith.constant 0 : i32
    return %c0_i32, %c0_i32_0 : i32, i32
  }
  func.func @transform_6(%arg0: i32) -> (i32, i32) {
    %c0_i32 = arith.constant 0 : i32
    %c0_i32_0 = arith.constant 0 : i32
    %c0_i32_1 = arith.constant 0 : i32
    return %c0_i32, %c0_i32_0 : i32, i32
  }
  func.func @transform_7(%arg0: i32) -> (i32, i32) {
    %c0_i32 = arith.constant 0 : i32
    %c0_i32_0 = arith.constant 0 : i32
    return %c0_i32, %arg0 : i32, i32
  }
  func.func @transform_8(%arg0: i32) -> (i32, i32) {
    %c0_i32 = arith.constant 0 : i32
    %c0_i32_0 = arith.constant 0 : i32
    %c0_i32_1 = arith.constant 0 : i32
    return %c0_i32, %c0_i32_0 : i32, i32
  }
  func.func @transform_9(%arg0: i32) -> (i32, i32) {
    %c0_i32 = arith.constant 0 : i32
    %c0_i32_0 = arith.constant 0 : i32
    %c0_i32_1 = arith.constant 0 : i32
    return %c0_i32, %c0_i32_0 : i32, i32
  }
}

</mosaic_0001>

<bundles_post_ra>
// kernel: tpu_custom_call.1
= control target key start
LH: loop header
LB: loop body
LE: loop exit
PB: predicated region body
PF: predicated region fallthrough
CT: control target
= control target key end

     0   :  { %vm59_vm0 = vcmask 1043456   ;;  %vm52_vm1 = vcmask 31744   ;;  %s531_s0 = inlined_call_operand.vmem [shape: f32[4,128], index: 0, kind: input, shape index: {}]   ;;  %s532_s1 = inlined_call_operand.vmem [shape: f32[16,4], index: 1, kind: input, shape index: {}]   ;;  %s533_s2 = inlined_call_operand.vmem [shape: f32[16,1], index: 2, kind: input, shape index: {}]   ;;  %s534_s3 = inlined_call_operand.vmem [shape: f32[8,16], index: 3, kind: input, shape index: {}]   ;;  %s535_s4 = inlined_call_operand.vmem [shape: f32[8,1], index: 4, kind: input, shape index: {}]   ;;  %s536_s5 = inlined_call_operand.vmem [shape: f32[2,8], index: 5, kind: input, shape index: {}]   ;;  %s537_s6 = inlined_call_operand.vmem [shape: f32[2,1], index: 6, kind: input, shape index: {}]   ;;  %s538_s7 = inlined_call_operand.hbm [shape: f32[2,128], index: 7, kind: output, shape index: {0}]   ;;  %s539_s8 = inlined_call_operand.vmem [shape: f32[2,1], index: 8, kind: output, shape index: {1}]   ;;  %s540_s9 = inlined_call_operand.vmem [shape: f32[2,1], index: 9, kind: output, shape index: {2}]  }
   0x1   :  { %v37_v0 = vld [vmem:[%s531_s0] sm:$0xf]  ;;  %v39_v2 = vld [vmem:[%s532_s1 + $0x8] sm:$0xff] }
   0x2   :  { %v38_v1 = vld [vmem:[%s532_s1] sm:$0xff]  ;;  %372 = vmatprep.subr.msk.mxu0 %vm59_vm0, %v37_v0  ;;  %v41_v3 = vld [vmem:[%s533_s2 + $0x8] sm:$0xff] }
   0x3   :  { %374 = vmatprep.mubr.msk.f32.mxu0 %vm52_vm1, %v38_v1 }
   0x4   :  { %15 = vsyncpa [#allocation3], 0  ;;  %373 = vmatpush3.msk.msra.mxu0 %vm59_vm0, %v37_v0  ;;  %v422_v4 = vmov 0   ;;  %v40_v5 = vld [vmem:[%s533_s2] sm:$0xff]  ;;  %v423_v6 = vmov 0.0   ;;  %vm424_vm2 = vmmov 0   ;;  %v304_v24 = vlaneseq }
   0x5   :  { %394 = vset.pattern.permute.xlu0 %v422_v4  ;;  %375 = vmatmul.mubr.msk.f32.vlgmr.msra.gmra.mxu0 %vm52_vm1, %v39_v2  ;;  %v141_v7 = vld [vmem:[%s535_s4] sm:$0xff]  ;;  %vm147_vm3 = vcmask 130048   ;;  %vm229_vm4 = vcmask 64512   ;;  %vm312_vm6 = vcmask 1041408   ;;  %vm34_vm7 = vcmask 1024   ;;  %s426_s28 = smov [#allocation2]  }
   0x6   :  { %49 = vperm.xlu0 %394, %v41_v3   ;;  %395 = vset.pattern.permute.xlu1 %v422_v4  ;;  %v223_v8 = vld [vmem:[%s537_s6] sm:$0x3]  ;;  %v305_v25 = vand.u32 127, %v304_v24  ;;  %v425_v32 = vmov -1e+30   ;;  %s343_s29 = sshll.u32 %s426_s28, 4  ;;  %s344_s29 = int_to_ptr.vmem [resolvable:$true] %s343_s29 }
   0x7   :  { %377 = vmatprep.subr.mxu1 %v423_v6  ;;  %384 = vmatprep.subr.mxu0 %v423_v6  ;;  %v140_v17 = vld [vmem:[%s534_s3] sm:$0xff]  ;;  %35 = vst.msk [vmem:[%s539_s8] sm:$0x3] %vm34_vm7, %v425_v32  ;;  %36 = vst.msk [vmem:[%s540_s9] sm:$0x3] %vm34_vm7, %v423_v6  ;;  %s400_s30 = scalar_lea.vmem %s344_s29, 32  ;;  %p405_p1 = scmp.lt.s32.totalorder %s344_s29, %s344_s29 }
   0x8   :  { %381 = vmatprep.mubr.msk.f32.mxu1 %vm424_vm2, %v423_v6  ;;  %386 = vmatprep.mubr.msk.f32.mxu0 %vm424_vm2, %v423_v6  ;;  %v222_v23 = vld [vmem:[%s536_s5] sm:$0x3]  ;;  %vm309_vm5 = vcmp.lt.s32.totalorder %v305_v25, 8  ;;  %p401_p0 = scmp.ne.s32.totalorder %s344_s29, %s400_s30  ;;  %p406_p2 = scmp.lt.s32.totalorder %s400_s30, %s400_s30 }
   0x9   :  { %144 = vperm.xlu1 %395, %v141_v7  }
   0xa   :  { %44 = vperm.xlu0 %394, %v40_v5   ;;  %p407_p3 = por %p406_p2, %p405_p1 }
   0xc   :  { %p408_p4 = pnand %p407_p3, %p401_p0 }
   0xd   :  { %226 = vperm.xlu1 %395, %v223_v8  }
   0xe   :  { %v311_v33 = vld [vmem:[%s539_s8] sm:$0x3] }
  0x81   :  { %v50_v9 = vpop.permute.xlu0 %49 }
  0x84   :  { %v145_v18 = vpop.permute.xlu1 %144 }
  0x85   :  { %v45_v12 = vpop.permute.xlu0 %44 }
  0x88   :  { %v227_v26 = vpop.permute.xlu1 %226 }
  0xc5   :  { %v376_v10 = vpop.f32.mrf.mxu0 }
  0xc6   :  { %v135_v11 = vadd.f32 %v376_v10, %v50_v9 }
  0xc7   :  { %v129_v13 = vpop.f32.mrf.mxu0 }
  0xc8   :  { %v139_v14 = vmax.f32 %v135_v11, 0.0  ;;  %v130_v15 = vadd.f32 %v129_v13, %v45_v12 }
  0xca   :  { %v138_v16 = vmax.f32 %v130_v15, 0.0  ;;  %378 = vmatpush3.msra.mxu1 %v139_v14 }
  0xcb   :  { %379 = vmatprep.subr.mxu1 %v423_v6 }
  0xcc   :  { %380 = vmatpush3.msra.mxu1 %v138_v16 }
  0xcd   :  { %382 = vmatmul.mubr.msk.f32.vlgmr.msra.gmra.mxu1 %vm147_vm3, %v140_v17 }
 0x18d   :  { %v217_v19 = vpop.f32.mrf.mxu1 }
 0x18e   :  { %v218_v20 = vadd.f32 %v217_v19, %v145_v18 }
 0x18f   :  { %v383_v21 = vpop.f32.mrf.mxu1 }
 0x190   :  { %v221_v22 = vmax.f32 %v218_v20, 0.0 }
 0x192   :  { %385 = vmatpush3.msra.mxu0 %v221_v22 }
 0x193   :  { %387 = vmatmul.mubr.msk.f32.vlgmr.msra.gmra.mxu0 %vm229_vm4, %v222_v23 }
 0x253   :  { %v299_v27 = vpop.f32.mrf.mxu0 }
 0x254   :  { %v300_v28 = vadd.f32 %v299_v27, %v227_v26 }
 0x255   :  { %v388_v29 = vpop.f32.mrf.mxu0 }
 0x256   :  { %303 = vst [vmem:[#allocation2] sm:$0x3] %v300_v28  ;;  %v310_v30 = vsel %vm309_vm5, %v300_v28, -1e+30 }
 0x257   :  { %v313_v31 = vsel %vm312_vm6, %v310_v30, -inf }
 0x258   :  { %314 = vmax.xlane.f32.xlu0 %v313_v31 }
 0x2e1   :  { %v315_v34 = vpop.xlane.xlu0 %314 }
 0x2e2   :  { %v316_v35 = vmax.f32 %v311_v33, %v315_v34 }
 0x2e4   :  { %v317_v36 = vsub.f32 %v311_v33, %v316_v35  ;;  %336 = vst.msk [vmem:[%s539_s8] sm:$0x3] %vm34_vm7, %v316_v35  ;;  %322 = vperm.xlu1 %395, %v316_v35  }
 0x35f   :  { %v323_v37 = vpop.permute.xlu1 %322 }
 0x360   :  { %v325_v38 = vsub.f32 %v310_v30, %v323_v37 }
 0x362   :  { %v326_v39 = vmul.f32 1.442695, %v325_v38 }
 0x364   :  { %396 = vpow2.f32 %v326_v39 }
 0x371   :  { %v397_v40 = vpop.eup %396 }
 0x372   :  { %v330_v41 = vsel %vm312_vm6, %v397_v40, 0.0 }
 0x373   :  { %331 = vadd.xlane.f32.xlu1 %v330_v41 }
 0x374   :  { %411 = shalt.err (!%p408_p4)
}
 0x375   :  { %346 = dma.vmem_to_hbm [thread:$0]  %s344_s29, 32, %s538_s7, [#allocation3]   ;;  %v318_v42 = vmul.f32 1.442695, %v317_v36  ;;  %v328_v44 = vld [vmem:[%s540_s9] sm:$0x3] }
 0x377   :  { %398 = vpow2.f32 %v318_v42 }
 0x384   :  { %v399_v43 = vpop.eup %398 }
 0x385   :  { %v329_v45 = vmul.f32 %v399_v43, %v328_v44 }
 0x3fc   :  { %v332_v46 = vpop.xlane.xlu1 %331 }
 0x3fd   :  { %v333_v47 = vadd.f32 %v332_v46, %v329_v45 }
 0x3ff   :  { %335 = vst.msk [vmem:[%s540_s9] sm:$0x3] %vm34_vm7, %v333_v47 }
 0x400   :  { %420 = dma.done.wait [#allocation3], 32  }
 0x401   :  { %421 = vsyncadd [#allocation3], 4294967264 }
 0x402   :  { %358 = vsyncpa [#allocation3], 1 }

</bundles_post_ra>
